<compile_context>
chip_gen: v7x
topology: tpu7x:2x2x1
jax: 0.10.0
libtpu: 0.0.40
codegen_flags: <defaults>
</compile_context>

<pallas_src>
import jax
import jax.numpy as jnp
from jax.experimental import pallas as pl
from jax.experimental.pallas import tpu as pltpu


def _nw_kernel(w_ref, q_ref, k_ref, v_ref, o_ref):
    # Scalar coefficient on the scalar ALU: s = (q - k)^2 * (-w^2 / 2)
    w = w_ref[0, 0]
    c = w * w * -0.5

    q = q_ref[...]                       # (1, N) broadcasts across K sublanes
    k = k_ref[...]                       # (K, N)
    v = v_ref[...]                       # (K, N)

    d = q - k
    s = d * d * c                        # scores, (K, N)

    # numerically-stable softmax over K (sublane axis), fused with the
    # value contraction:  out = sum(e * v) / sum(e)
    m = jnp.max(s, axis=0, keepdims=True)         # (1, N)  XLU
    e = jnp.exp(s - m)                            # (K, N)  EUP
    denom = jnp.sum(e, axis=0, keepdims=True)     # (1, N)  XLU
    num = jnp.sum(e * v, axis=0, keepdims=True)   # (1, N)  VPU + XLU

    # EUP approximate reciprocal (~2^-12 rel err) + one Newton step -> f32 acc.
    r = pl.reciprocal(denom, approx=True)
    r = r * (2.0 - denom * r)
    o_ref[...] = num * r


def nw_kernel_regression(queries, keys, values, w):
    """queries: (N,), keys: (N, K), values: (N, K), w: scalar -> (N,)"""
    n, k = keys.shape
    # layout plumbing only: lane-dense N, K on sublanes
    q2 = queries.reshape(1, n).astype(jnp.float32)
    k2 = keys.T.astype(jnp.float32)               # (K, N)
    v2 = values.T.astype(jnp.float32)             # (K, N)
    w2 = jnp.asarray(w, jnp.float32).reshape(1, 1)

    out = pl.pallas_call(
        _nw_kernel,
        out_shape=jax.ShapeDtypeStruct((1, n), jnp.float32),
        in_specs=[
            pl.BlockSpec(memory_space=pltpu.MemorySpace.SMEM),   # w scalar
            pl.BlockSpec(memory_space=pltpu.MemorySpace.VMEM),   # queries (1, N)
            pl.BlockSpec(memory_space=pltpu.MemorySpace.VMEM),   # keys    (K, N)
            pl.BlockSpec(memory_space=pltpu.MemorySpace.VMEM),   # values  (K, N)
        ],
        out_specs=pl.BlockSpec(memory_space=pltpu.MemorySpace.VMEM),
    )(w2, q2, k2, v2)
    return out.reshape(-1)


def _f(x):
    # f(x) = 2*sin(x) + x**0.8
    return 2.0 * jnp.sin(x) + jnp.power(x, 0.8)


def _reference(queries, keys, values, w):
    q = jnp.broadcast_to(queries[:, None], keys.shape)
    s = -(((q - keys) * w) ** 2) / 2.0
    a = jax.nn.softmax(s, axis=1)
    return jnp.sum(a * values, axis=1)


if __name__ == "__main__":
    # Shapes from the reference script: x_test = arange(0, 5, 0.1) -> 50 queries,
    # n_train = 50 keys/values per query.
    n_train = 50
    x_test = jnp.arange(0.0, 5.0, 0.1, dtype=jnp.float32)        # (50,)
    n_test = x_test.shape[0]

    key = jax.random.PRNGKey(0)
    k_w, k_x, k_noise = jax.random.split(key, 3)

    # Deterministic parameter init (torch.rand((1,)) analogue).
    w = jax.random.uniform(k_w, (1,), dtype=jnp.float32)[0]

    # Synthetic training data: x_train sorted uniform on [0, 5), y = f(x) + noise.
    x_train = jnp.sort(jax.random.uniform(k_x, (n_train,), dtype=jnp.float32) * 5.0)
    y_train = _f(x_train) + 0.5 * jax.random.normal(k_noise, (n_train,), dtype=jnp.float32)

    # keys/values repeated per query, as in the reference script.
    keys = jnp.tile(x_train[None, :], (n_test, 1))      # (N, K)
    values = jnp.tile(y_train[None, :], (n_test, 1))    # (N, K)

    out = nw_kernel_regression(x_test, keys, values, w)
    out = jax.block_until_ready(out)

    ref = _reference(x_test, keys, values, w)
    assert out.shape == (n_test,)
    assert jnp.allclose(out, ref, atol=1e-5, rtol=1e-5), (out, ref)

    print("KERNEL_OK")
</pallas_src>

<mosaic_0001>
module attributes {stable_mosaic.version = 11 : i64} {
  func.func @_nw_kernel(%arg0: memref<1x1xf32, #tpu.memory_space<smem>>, %arg1: memref<1x50xf32, #tpu.memory_space<vmem>>, %arg2: memref<50x50xf32, #tpu.memory_space<vmem>>, %arg3: memref<50x50xf32, #tpu.memory_space<vmem>>, %arg4: memref<1x50xf32, #tpu.memory_space<vmem>>) attributes {dimension_semantics = [], scalar_prefetch = 0 : i64, scratch_operands = 0 : i64, tpu.core_type = #tpu.core_type<tc>} {
    %c0 = arith.constant 0 : index
    %c0_0 = arith.constant 0 : index
    %0 = memref.load %arg0[%c0, %c0_0] : memref<1x1xf32, #tpu.memory_space<smem>>
    %1 = arith.mulf %0, %0 : f32
    %cst = arith.constant -5.000000e-01 : f32
    %2 = arith.mulf %1, %cst : f32
    %c0_1 = arith.constant 0 : index
    %c0_2 = arith.constant 0 : index
    %3 = vector.load %arg1[%c0_1, %c0_2] : memref<1x50xf32, #tpu.memory_space<vmem>>, vector<1x50xf32>
    %c0_3 = arith.constant 0 : index
    %c0_4 = arith.constant 0 : index
    %4 = vector.load %arg2[%c0_3, %c0_4] : memref<50x50xf32, #tpu.memory_space<vmem>>, vector<50x50xf32>
    %c0_5 = arith.constant 0 : index
    %c0_6 = arith.constant 0 : index
    %5 = vector.load %arg3[%c0_5, %c0_6] : memref<50x50xf32, #tpu.memory_space<vmem>>, vector<50x50xf32>
    %6 = vector.broadcast %3 : vector<1x50xf32> to vector<50x50xf32>
    %7 = arith.subf %6, %4 : vector<50x50xf32>
    %8 = arith.mulf %7, %7 : vector<50x50xf32>
    %9 = vector.broadcast %2 : f32 to vector<50x50xf32>
    %10 = arith.mulf %8, %9 : vector<50x50xf32>
    %cst_7 = arith.constant dense<0xFF800000> : vector<50xf32>
    %11 = vector.multi_reduction <maximumf>, %10, %cst_7 [0] : vector<50x50xf32> to vector<50xf32>
    %12 = vector.shape_cast %11 : vector<50xf32> to vector<1x50xf32>
    %13 = vector.broadcast %12 : vector<1x50xf32> to vector<50x50xf32>
    %14 = arith.subf %10, %13 : vector<50x50xf32>
    %15 = math.exp %14 : vector<50x50xf32>
    %cst_8 = arith.constant dense<0.000000e+00> : vector<50xf32>
    %16 = vector.multi_reduction <add>, %15, %cst_8 [0] : vector<50x50xf32> to vector<50xf32>
    %17 = vector.shape_cast %16 : vector<50xf32> to vector<1x50xf32>
    %18 = arith.mulf %15, %5 : vector<50x50xf32>
    %cst_9 = arith.constant dense<0.000000e+00> : vector<50xf32>
    %19 = vector.multi_reduction <add>, %18, %cst_9 [0] : vector<50x50xf32> to vector<50xf32>
    %20 = vector.shape_cast %19 : vector<50xf32> to vector<1x50xf32>
    %21 = tpu.reciprocal %17 {approx = true} : vector<1x50xf32> -> vector<1x50xf32>
    %22 = arith.mulf %17, %21 : vector<1x50xf32>
    %cst_10 = arith.constant 2.000000e+00 : f32
    %23 = vector.broadcast %cst_10 : f32 to vector<1x50xf32>
    %24 = arith.subf %23, %22 : vector<1x50xf32>
    %25 = arith.mulf %21, %24 : vector<1x50xf32>
    %26 = arith.mulf %20, %25 : vector<1x50xf32>
    %c0_11 = arith.constant 0 : index
    %c0_12 = arith.constant 0 : index
    %27 = vector.load %arg4[%c0_11, %c0_12] : memref<1x50xf32, #tpu.memory_space<vmem>>, vector<1x50xf32>
    tpu.vector_store %arg4[%c0_11, %c0_12], %26 {strides = array<i32>} : memref<1x50xf32, #tpu.memory_space<vmem>>, vector<1x50xf32>,
    return
  }
}

</mosaic_0001>

<bundles_post_ra>
// kernel: tpu_custom_call.1
= control target key start
LH: loop header
LB: loop body
LE: loop exit
PB: predicated region body
PF: predicated region fallthrough
CT: control target
= control target key end

     0   :  { %10 = vsyncpa [#allocation4], 0  ;;  %s391_s0 = inlined_call_operand.<no memory space> [shape: f32[1,1], index: 0, kind: input, shape index: {}]   ;;  %s392_s1 = inlined_call_operand.vmem [shape: f32[1,50], index: 1, kind: input, shape index: {}]   ;;  %s393_s2 = inlined_call_operand.hbm [shape: f32[50,50], index: 2, kind: input, shape index: {}]   ;;  %s394_s3 = inlined_call_operand.hbm [shape: f32[50,50], index: 3, kind: input, shape index: {}]   ;;  %s395_s4 = inlined_call_operand.hbm [shape: f32[1,50], index: 4, kind: output, shape index: {}]  }
   0x1   :  { %11 = vsyncpa [#allocation7], 0 }
   0x2   :  { %12 = vsyncpa [#allocation5], 0  ;;  %s297_s15 = smov [#allocation3]   ;;  %s225_s19 = scalar_lea.hbm %s393_s2, 896 }
   0x3   :  { %s22_s16 = sshll.u32 %s297_s15, 4  ;;  %p226_p0 = scmp.ne.s32.totalorder %s393_s2, %s225_s19  ;;  %s23_s16 = int_to_ptr.vmem [resolvable:$true] %s22_s16 }
   0x4   :  { %p229_p1 = scmp.lt.u32.totalorder %s225_s19, %s393_s2 }
   0x6   :  { %p231_p2 = pnand %p229_p1, %p226_p0 }
   0x8   :  { %234 = shalt.err (!%p231_p2)
}
   0x9   :  { %s235_s24 = scalar_lea.vmem %s23_s16, 896  ;;  %p240_p4 = scmp.lt.s32.totalorder %s23_s16, %s23_s16 }
   0xa   :  { %p236_p3 = scmp.ne.s32.totalorder %s23_s16, %s235_s24  ;;  %p241_p5 = scmp.lt.s32.totalorder %s235_s24, %s235_s24 }
   0xc   :  { %p242_p6 = por %p241_p5, %p240_p4 }
   0xe   :  { %p243_p7 = pnand %p242_p6, %p236_p3 }
  0x10   :  { %246 = shalt.err (!%p243_p7)
}
  0x11   :  { %s298_s25 = smov 128   ;;  %s299_s26 = smov 8  }
  0x12   :  { %28 = dma.hbm_to_vmem [thread:$0]  %s393_s2, 896, %s23_s16, [#allocation4], %s298_s25, %s298_s25, %s299_s26  }
  0x13   :  { %s300_s29 = smov [#allocation6]   ;;  %s247_s7 = scalar_lea.hbm %s394_s3, 896 }
  0x14   :  { %s34_s30 = sshll.u32 %s300_s29, 4  ;;  %p248_p8 = scmp.ne.s32.totalorder %s394_s3, %s247_s7  ;;  %s35_s30 = int_to_ptr.vmem [resolvable:$true] %s34_s30 }
  0x15   :  { %p251_p9 = scmp.lt.u32.totalorder %s247_s7, %s394_s3 }
  0x17   :  { %p253_p10 = pnand %p251_p9, %p248_p8 }
  0x19   :  { %256 = shalt.err (!%p253_p10)
}
  0x1a   :  { %s257_s12 = scalar_lea.vmem %s35_s30, 896  ;;  %p262_p12 = scmp.lt.s32.totalorder %s35_s30, %s35_s30 }
  0x1b   :  { %p258_p11 = scmp.ne.s32.totalorder %s35_s30, %s257_s12  ;;  %p263_p13 = scmp.lt.s32.totalorder %s257_s12, %s257_s12 }
  0x1d   :  { %p264_p0 = por %p263_p13, %p262_p12 }
  0x1f   :  { %p265_p1 = pnand %p264_p0, %p258_p11 }
  0x21   :  { %268 = shalt.err (!%p265_p1)
}
  0x22   :  { %40 = dma.hbm_to_vmem [thread:$0]  %s394_s3, 896, %s35_s30, [#allocation7], %s298_s25, %s298_s25, %s299_s26  }
  0x23   :  { %291 = dma.done.wait [#allocation4], 896  }
  0x24   :  { %292 = vsyncadd [#allocation4], 4294966400 }
  0x25   :  { %293 = dma.done.wait [#allocation7], 896  }
  0x26   :  { %294 = vsyncadd [#allocation7], 4294966400  ;;  %s48_s16 = smul.f32 %s391_s0, %s391_s0  ;;  %v203_v0 = vld [vmem:[%s392_s1] ss:$0 sm:$0xff]  ;;  %v52_v2 = vld [vmem:[#allocation3 + $0x8] sm:$0xff]  ;;  %vm93_vm0 = vcmask 408576  }
  0x27   :  { %v51_v1 = vld [vmem:[#allocation3] sm:$0xff]  ;;  %v53_v3 = vld [vmem:[#allocation3 + $0x10] sm:$0xff]  ;;  %v54_v4 = vld [vmem:[#allocation3 + $0x18] sm:$0xff]  ;;  %v72_v7 = vsub.f32 %v203_v0, %v52_v2  ;;  %vm102_vm1 = vcmask 402432   ;;  %s301_s0 = smov [#allocation8]   ;;  %vm185_vm2 = vcmask 401408  }
  0x28   :  { %s49_s17 = smul.f32 -0.5, %s48_s16  ;;  %v55_v5 = vld [vmem:[#allocation3 + $0x20] sm:$0xff]  ;;  %v71_v6 = vsub.f32 %v203_v0, %v51_v1  ;;  %v56_v8 = vld [vmem:[#allocation3 + $0x28] sm:$0xff]  ;;  %v57_v9 = vld [vmem:[#allocation3 + $0x30] sm:$0x3]  ;;  %v73_v10 = vsub.f32 %v203_v0, %v53_v3  ;;  %v74_v11 = vsub.f32 %v203_v0, %v54_v4  ;;  %s193_s1 = sshll.u32 %s301_s0, 4  ;;  %s194_s1 = int_to_ptr.vmem [resolvable:$true] %s193_s1 }
  0x29   :  { %v75_v12 = vsub.f32 %v203_v0, %v55_v5  ;;  %v76_v14 = vsub.f32 %v203_v0, %v56_v8  ;;  %v77_v15 = vsub.f32 %v203_v0, %v57_v9  ;;  %v79_v17 = vmul.f32 %v72_v7, %v72_v7  ;;  %v58_v63 = vld [vmem:[#allocation6] sm:$0xff]  ;;  %v59_v0 = vld [vmem:[#allocation6 + $0x8] sm:$0xff]  ;;  %v60_v2 = vld [vmem:[#allocation6 + $0x10] sm:$0xff]  ;;  %s269_s3 = scalar_lea.vmem %s194_s1, 16  ;;  %s273_s20 = scalar_lea.vmem %s194_s1, 32 }
  0x2a   :  { %v85_v13 = vstv %s49_s17  ;;  %v78_v16 = vmul.f32 %v71_v6, %v71_v6  ;;  %v80_v18 = vmul.f32 %v73_v10, %v73_v10  ;;  %v81_v19 = vmul.f32 %v74_v11, %v74_v11  ;;  %v61_v4 = vld [vmem:[#allocation6 + $0x18] sm:$0xff]  ;;  %v62_v8 = vld [vmem:[#allocation6 + $0x20] sm:$0xff]  ;;  %p270_p2 = scmp.ne.s32.totalorder %s194_s1, %s269_s3  ;;  %p274_p3 = scmp.lt.s32.totalorder %s194_s1, %s194_s1 }
  0x2b   :  { %v82_v20 = vmul.f32 %v75_v12, %v75_v12  ;;  %v83_v21 = vmul.f32 %v76_v14, %v76_v14  ;;  %v84_v22 = vmul.f32 %v77_v15, %v77_v15  ;;  %v87_v24 = vmul.f32 %v85_v13, %v79_v17  ;;  %v63_v12 = vld [vmem:[#allocation6 + $0x28] sm:$0xff]  ;;  %p275_p4 = scmp.lt.s32.totalorder %s273_s20, %s269_s3 }
  0x2c   :  { %v86_v23 = vmul.f32 %v85_v13, %v78_v16  ;;  %v88_v25 = vmul.f32 %v85_v13, %v80_v18  ;;  %v89_v26 = vmul.f32 %v85_v13, %v81_v19 }
  0x2d   :  { %v90_v27 = vmul.f32 %v85_v13, %v82_v20  ;;  %v91_v28 = vmul.f32 %v85_v13, %v83_v21  ;;  %v92_v29 = vmul.f32 %v85_v13, %v84_v22  ;;  %v95_v31 = vsel %vm93_vm0, %v87_v24, -inf  ;;  %p276_p5 = por %p275_p4, %p274_p3 }
  0x2e   :  { %v94_v30 = vsel %vm93_vm0, %v86_v23, -inf  ;;  %v96_v32 = vsel %vm93_vm0, %v88_v25, -inf  ;;  %v97_v34 = vsel %vm93_vm0, %v89_v26, -inf }
  0x2f   :  { %v98_v33 = vsel %vm93_vm0, %v90_v27, -inf  ;;  %v100_v36 = vsel %vm93_vm0, %v91_v28, -inf  ;;  %v103_v37 = vsel %vm102_vm1, %v92_v29, -inf  ;;  %p277_p6 = pnand %p276_p5, %p270_p2 }
  0x30   :  { %v99_v35 = vmax.f32 %v94_v30, %v98_v33  ;;  %v101_v38 = vmax.f32 %v95_v31, %v100_v36  ;;  %v104_v39 = vmax.f32 %v96_v32, %v103_v37 }
  0x32   :  { %v105_v40 = vmax.f32 %v99_v35, %v101_v38  ;;  %v106_v41 = vmax.f32 %v104_v39, %v97_v34 }
  0x34   :  { %v107_v42 = vmax.f32 %v105_v40, %v106_v41 }
  0x36   :  { %v108_v43 = vrot.slane %v107_v42, 4 }
  0x38   :  { %v109_v44 = vmax.f32 %v107_v42, %v108_v43 }
  0x3a   :  { %v110_v45 = vrot.slane %v109_v44, 2 }
  0x3c   :  { %v111_v46 = vmax.f32 %v109_v44, %v110_v45 }
  0x3e   :  { %v112_v47 = vrot.slane %v111_v46, 1 }
  0x40   :  { %v113_v48 = vmax.f32 %v111_v46, %v112_v47 }
  0x42   :  { %v114_v49 = vsub.f32 %v86_v23, %v113_v48  ;;  %v115_v50 = vsub.f32 %v87_v24, %v113_v48  ;;  %v116_v51 = vsub.f32 %v88_v25, %v113_v48  ;;  %v117_v52 = vsub.f32 %v89_v26, %v113_v48  ;;  %v64_v25 = vld [vmem:[#allocation6 + $0x30] sm:$0x3] }
  0x43   :  { %v118_v53 = vsub.f32 %v90_v27, %v113_v48  ;;  %v119_v54 = vsub.f32 %v91_v28, %v113_v48  ;;  %v120_v58 = vsub.f32 %v92_v29, %v113_v48 }
  0x44   :  { %v121_v55 = vmul.f32 1.442695, %v114_v49  ;;  %v123_v56 = vmul.f32 1.442695, %v115_v50  ;;  %v125_v57 = vmul.f32 1.442695, %v116_v51 }
  0x45   :  { %v127_v59 = vmul.f32 1.442695, %v117_v52  ;;  %v129_v60 = vmul.f32 1.442695, %v118_v53  ;;  %v131_v61 = vmul.f32 1.442695, %v119_v54 }
  0x46   :  { %209 = vpow2.f32 %v121_v55  ;;  %v133_v62 = vmul.f32 1.442695, %v120_v58 }
  0x47   :  { %211 = vpow2.f32 %v123_v56 }
  0x48   :  { %213 = vpow2.f32 %v125_v57 }
  0x49   :  { %215 = vpow2.f32 %v127_v59 }
  0x4a   :  { %217 = vpow2.f32 %v129_v60 }
  0x4b   :  { %219 = vpow2.f32 %v131_v61 }
  0x4c   :  { %221 = vpow2.f32 %v133_v62 }
  0x50   :  { %v210_v1 = vpop.eup %209 }
  0x51   :  { %v212_v3 = vpop.eup %211  ;;  %v135_v5 = vsel %vm93_vm0, %v210_v1, 0.0  ;;  %v154_v6 = vmul.f32 %v210_v1, %v58_v63 }
  0x52   :  { %v214_v7 = vpop.eup %213  ;;  %v136_v9 = vsel %vm93_vm0, %v212_v3, 0.0  ;;  %v155_v10 = vmul.f32 %v212_v3, %v59_v0 }
  0x53   :  { %v216_v11 = vpop.eup %215  ;;  %v137_v13 = vadd.f32 %v136_v9, %v135_v5  ;;  %v138_v14 = vsel %vm93_vm0, %v214_v7, 0.0  ;;  %v156_v15 = vmul.f32 %v214_v7, %v60_v2  ;;  %v161_v16 = vsel %vm93_vm0, %v154_v6, 0.0 }
  0x54   :  { %v218_v17 = vpop.eup %217  ;;  %v140_v18 = vsel %vm93_vm0, %v216_v11, 0.0  ;;  %v157_v19 = vmul.f32 %v216_v11, %v61_v4  ;;  %v162_v20 = vsel %vm93_vm0, %v155_v10, 0.0 }
  0x55   :  { %v220_v21 = vpop.eup %219  ;;  %v139_v22 = vadd.f32 %v138_v14, %v137_v13  ;;  %v158_v23 = vmul.f32 %v218_v17, %v62_v8  ;;  %v163_v24 = vadd.f32 %v162_v20, %v161_v16  ;;  %v142_v26 = vsel %vm93_vm0, %v218_v17, 0.0 }
  0x56   :  { %v159_v27 = vmul.f32 %v220_v21, %v63_v12  ;;  %v164_v28 = vsel %vm93_vm0, %v156_v15, 0.0  ;;  %v166_v29 = vsel %vm93_vm0, %v157_v19, 0.0  ;;  %v222_v30 = vpop.eup %221  ;;  %v144_v33 = vsel %vm93_vm0, %v220_v21, 0.0 }
  0x57   :  { %v141_v31 = vadd.f32 %v140_v18, %v139_v22  ;;  %v165_v32 = vadd.f32 %v164_v28, %v163_v24  ;;  %v168_v34 = vsel %vm93_vm0, %v158_v23, 0.0  ;;  %v160_v36 = vmul.f32 %v222_v30, %v64_v25 }
  0x58   :  { %v146_v38 = vsel %vm102_vm1, %v222_v30, 0.0  ;;  %v170_v39 = vsel %vm93_vm0, %v159_v27, 0.0 }
  0x59   :  { %v143_v35 = vadd.f32 %v142_v26, %v141_v31  ;;  %v167_v37 = vadd.f32 %v166_v29, %v165_v32  ;;  %v172_v44 = vsel %vm102_vm1, %v160_v36, 0.0 }
  0x5b   :  { %v145_v40 = vadd.f32 %v144_v33, %v143_v35  ;;  %v169_v41 = vadd.f32 %v168_v34, %v167_v37 }
  0x5d   :  { %v147_v42 = vadd.f32 %v146_v38, %v145_v40  ;;  %v171_v43 = vadd.f32 %v170_v39, %v169_v41 }
  0x5f   :  { %v148_v45 = vrot.slane %v147_v42, 4  ;;  %v173_v46 = vadd.f32 %v172_v44, %v171_v43 }
  0x61   :  { %v149_v47 = vadd.f32 %v148_v45, %v147_v42  ;;  %v174_v49 = vrot.slane %v173_v46, 4 }
  0x63   :  { %v150_v48 = vrot.slane %v149_v47, 2  ;;  %v175_v52 = vadd.f32 %v174_v49, %v173_v46 }
  0x65   :  { %v151_v50 = vadd.f32 %v150_v48, %v149_v47  ;;  %v176_v54 = vrot.slane %v175_v52, 2 }
  0x67   :  { %v152_v51 = vrot.slane %v151_v50, 1  ;;  %v177_v55 = vadd.f32 %v176_v54, %v175_v52 }
  0x69   :  { %v153_v53 = vadd.f32 %v152_v51, %v151_v50  ;;  %v178_v56 = vrot.slane %v177_v55, 1 }
  0x6b   :  { %223 = vrcp.f32 %v153_v53  ;;  %v179_v59 = vadd.f32 %v178_v56, %v177_v55 }
  0x75   :  { %v224_v57 = vpop.eup %223 }
  0x76   :  { %v181_v58 = vmul.f32 %v224_v57, %v153_v53 }
  0x78   :  { %v182_v60 = vsub.f32 2.0, %v181_v58 }
  0x7a   :  { %v183_v61 = vmul.f32 %v224_v57, %v182_v60 }
  0x7c   :  { %v184_v62 = vmul.f32 %v183_v61, %v179_v59 }
  0x7e   :  { %186 = vst.msk [vmem:[#allocation8] sm:$0x1] %vm185_vm2, %v184_v62 }
  0x7f   :  { %280 = shalt.err (!%p277_p6)
}
  0x80   :  { %s281_s23 = scalar_lea.hbm %s395_s4, 16 }
  0x81   :  { %p282_p7 = scmp.ne.s32.totalorder %s395_s4, %s281_s23  ;;  %p285_p8 = scmp.lt.u32.totalorder %s281_s23, %s395_s4 }
  0x83   :  { %p287_p9 = pnand %p285_p8, %p282_p7 }
  0x85   :  { %290 = shalt.err (!%p287_p9)
}
  0x86   :  { %196 = dma.vmem_to_hbm [thread:$0]  %s194_s1, 16, %s395_s4, [#allocation5]  }
  0x87   :  { %295 = dma.done.wait [#allocation5], 16  }
  0x88   :  { %296 = vsyncadd [#allocation5], 4294967280 }
  0x89   :  { %200 = vsyncpa [#allocation4], 1 }
  0x8a   :  { %201 = vsyncpa [#allocation7], 1 }
  0x8b   :  { %202 = vsyncpa [#allocation5], 1 }

</bundles_post_ra>
